<compile_context>
chip_gen: v7x
topology: tpu7x:2x2x1
jax: 0.10.0
libtpu: 0.0.40
codegen_flags: <defaults>
</compile_context>

<pallas_src>
import functools
import math

import jax
import jax.numpy as jnp
from jax.experimental import pallas as pl
from jax.experimental.pallas import tpu as pltpu

_LANES = 128
_SUBLANES = 8


def _round_up(x, m):
    return (x + m - 1) // m * m


def _amax_kernel(x_ref, o_ref, acc_ref, *, fill):
    k = pl.program_id(1)

    # Init the accumulator at the first reduction chunk of every row block.
    @pl.when(k == 0)
    def _init():
        acc_ref[...] = jnp.full(acc_ref.shape, fill, dtype=acc_ref.dtype)

    # Hot loop: per-lane (VPU) max of each 128-wide lane slice of the input
    # tile into the (tr, 128) VMEM accumulator.
    tk = x_ref.shape[1]
    for j in range(tk // _LANES):
        chunk = x_ref[:, j * _LANES:(j + 1) * _LANES]
        acc_ref[...] = jnp.maximum(acc_ref[...], chunk.astype(acc_ref.dtype))

    # Finalize: one cross-lane (XLU) reduce per row block.
    @pl.when(k == pl.num_programs(1) - 1)
    def _fini():
        row_max = jnp.max(acc_ref[...], axis=-1, keepdims=True)   # (tr, 1)
        o_ref[...] = row_max.reshape(o_ref.shape).astype(o_ref.dtype)


def pallas_amax(x, dims):
    """torch.amax(x, dims) equivalent (keepdim=False) as a tiled Pallas TPU kernel."""
    if isinstance(dims, int):
        dims = (dims,)
    ndim = x.ndim
    dims = tuple(sorted(d % ndim for d in dims))
    keep = tuple(d for d in range(ndim) if d not in dims)

    perm = keep + dims
    if perm != tuple(range(ndim)):
        # TODO(synk): fold non-trailing reduce dims into the BlockSpec
        # index_map instead of materializing an HBM transpose; for the
        # module's NCHW dims=(2, 3) use case perm is the identity (no-op).
        x = jnp.transpose(x, perm)

    keep_shape = tuple(x.shape[:len(keep)])
    rows = int(math.prod(keep_shape)) if keep_shape else 1
    red = int(math.prod(x.shape[len(keep):]))

    dtype = x.dtype
    if jnp.issubdtype(dtype, jnp.floating):
        acc_dtype, fill = jnp.float32, float("-inf")
    elif jnp.issubdtype(dtype, jnp.unsignedinteger):
        acc_dtype, fill = jnp.uint32, 0
    elif jnp.issubdtype(dtype, jnp.integer):
        acc_dtype, fill = jnp.int32, int(jnp.iinfo(dtype).min)
    else:
        raise NotImplementedError(f"pallas_amax: unsupported dtype {dtype}")
    itemsize = jnp.dtype(dtype).itemsize

    # --- tile sizing --------------------------------------------------------
    # Row tile (kept axis -> sublane dim of the input block).
    tr = min(_round_up(rows, _SUBLANES), 512)
    rows_padded = _round_up(rows, tr)

    # Reduction chunk (lane dim): ~4 MiB per input buffer (8 MiB
    # double-buffered), capped so the in-kernel unroll stays <= 32 chunks.
    per_buffer_bytes = 4 * 1024 * 1024
    tk_cap = (per_buffer_bytes // (tr * itemsize)) // _LANES * _LANES
    tk_cap = max(_LANES, min(tk_cap, 4096))
    tk = min(tk_cap, _round_up(red, _LANES))
    red_padded = _round_up(red, tk)

    # --- lane-dense 2D view; pad with the identity of max -------------------
    x2d = x.reshape(rows, red)
    if (rows_padded, red_padded) != (rows, red):
        x2d = jnp.pad(
            x2d,
            ((0, rows_padded - rows), (0, red_padded - red)),
            constant_values=fill,
        )

    n_row_blocks = rows_padded // tr
    n_red_blocks = red_padded // tk

    out = pl.pallas_call(
        functools.partial(_amax_kernel, fill=fill),
        out_shape=jax.ShapeDtypeStruct((n_row_blocks, tr, 1), dtype),
        grid=(n_row_blocks, n_red_blocks),
        in_specs=[pl.BlockSpec((tr, tk), lambda i, k: (i, k))],
        out_specs=pl.BlockSpec((1, tr, 1), lambda i, k: (i, 0, 0)),
        scratch_shapes=[pltpu.VMEM((tr, _LANES), acc_dtype)],
        compiler_params=pltpu.CompilerParams(
            dimension_semantics=("parallel", "arbitrary")),
    )(x2d)

    out = out.reshape(rows_padded)[:rows]
    return out.reshape(keep_shape)


if __name__ == "__main__":
    key = jax.random.PRNGKey(0)
    # Small NCHW input consistent with the module's typical hlb_cifar10 use
    # (global spatial max over H, W).
    x = jax.random.normal(key, (2, 4, 16, 16), dtype=jnp.float32)
    dims = (2, 3)

    out = jax.block_until_ready(pallas_amax(x, dims))

    # Correctness check vs plain-JAX reference (same semantics as torch.amax).
    ref = jnp.max(x, axis=dims)
    assert out.shape == ref.shape == (2, 4), (out.shape, ref.shape)
    assert jnp.allclose(out, ref), "Pallas amax mismatch vs reference"

    print("KERNEL_OK")
</pallas_src>

<mosaic_0001>
module attributes {stable_mosaic.version = 11 : i64} {
  func.func @_amax_kernel(%arg0: i32, %arg1: i32, %arg2: memref<8x256xf32, #tpu.memory_space<vmem>>, %arg3: memref<1x8x1xf32, #tpu.memory_space<vmem>>, %arg4: memref<8x128xf32, #tpu.memory_space<vmem>>) attributes {dimension_semantics = [#tpu.dimension_semantics<parallel>, #tpu.dimension_semantics<arbitrary>], iteration_bounds = array<i64: 1, 1>, scalar_prefetch = 0 : i64, scratch_operands = 1 : i64, tpu.core_type = #tpu.core_type<tc>, window_params = [{transform_indices = @transform_0, window_bounds = array<i64: 8, 256>}, {transform_indices = @transform_1, window_bounds = array<i64: 1, 8, 1>}]} {
    %c0_i32 = arith.constant 0 : i32
    %0 = arith.cmpi eq, %arg1, %c0_i32 : i32
    %1 = arith.extui %0 : i1 to i32
    %c0_i32_0 = arith.constant 0 : i32
    %2 = arith.cmpi ne, %1, %c0_i32_0 : i32
    scf.if %2 {
      %cst = arith.constant 0xFF800000 : f32
      %14 = vector.broadcast %cst : f32 to vector<8x128xf32>
      %c0_13 = arith.constant 0 : index
      %c0_14 = arith.constant 0 : index
      %15 = vector.load %arg4[%c0_13, %c0_14] : memref<8x128xf32, #tpu.memory_space<vmem>>, vector<8x128xf32>
      tpu.vector_store %arg4[%c0_13, %c0_14], %14 {strides = array<i32>} : memref<8x128xf32, #tpu.memory_space<vmem>>, vector<8x128xf32>,
    } else {
    }
    %c0 = arith.constant 0 : index
    %c0_1 = arith.constant 0 : index
    %3 = vector.load %arg2[%c0, %c0_1] : memref<8x256xf32, #tpu.memory_space<vmem>>, vector<8x128xf32>
    %c0_2 = arith.constant 0 : index
    %c0_3 = arith.constant 0 : index
    %4 = vector.load %arg4[%c0_2, %c0_3] : memref<8x128xf32, #tpu.memory_space<vmem>>, vector<8x128xf32>
    %5 = arith.maximumf %4, %3 : vector<8x128xf32>
    %c0_4 = arith.constant 0 : index
    %c0_5 = arith.constant 0 : index
    %6 = vector.load %arg4[%c0_4, %c0_5] : memref<8x128xf32, #tpu.memory_space<vmem>>, vector<8x128xf32>
    tpu.vector_store %arg4[%c0_4, %c0_5], %5 {strides = array<i32>} : memref<8x128xf32, #tpu.memory_space<vmem>>, vector<8x128xf32>,
    %c0_6 = arith.constant 0 : index
    %c128 = arith.constant 128 : index
    %7 = vector.load %arg2[%c0_6, %c128] : memref<8x256xf32, #tpu.memory_space<vmem>>, vector<8x128xf32>
    %c0_7 = arith.constant 0 : index
    %c0_8 = arith.constant 0 : index
    %8 = vector.load %arg4[%c0_7, %c0_8] : memref<8x128xf32, #tpu.memory_space<vmem>>, vector<8x128xf32>
    %9 = arith.maximumf %8, %7 : vector<8x128xf32>
    %c0_9 = arith.constant 0 : index
    %c0_10 = arith.constant 0 : index
    %10 = vector.load %arg4[%c0_9, %c0_10] : memref<8x128xf32, #tpu.memory_space<vmem>>, vector<8x128xf32>
    tpu.vector_store %arg4[%c0_9, %c0_10], %9 {strides = array<i32>} : memref<8x128xf32, #tpu.memory_space<vmem>>, vector<8x128xf32>,
    %c0_i32_11 = arith.constant 0 : i32
    %11 = arith.cmpi eq, %arg1, %c0_i32_11 : i32
    %12 = arith.extui %11 : i1 to i32
    %c0_i32_12 = arith.constant 0 : i32
    %13 = arith.cmpi ne, %12, %c0_i32_12 : i32
    scf.if %13 {
      %c0_13 = arith.constant 0 : index
      %c0_14 = arith.constant 0 : index
      %14 = vector.load %arg4[%c0_13, %c0_14] : memref<8x128xf32, #tpu.memory_space<vmem>>, vector<8x128xf32>
      %cst = arith.constant dense<0xFF800000> : vector<8xf32>
      %15 = vector.multi_reduction <maximumf>, %14, %cst [1] : vector<8x128xf32> to vector<8xf32>
      %16 = vector.shape_cast %15 : vector<8xf32> to vector<8x1xf32>
      %17 = vector.shape_cast %16 : vector<8x1xf32> to vector<1x8x1xf32>
      %c0_15 = arith.constant 0 : index
      %c0_16 = arith.constant 0 : index
      %c0_17 = arith.constant 0 : index
      %18 = vector.load %arg3[%c0_15, %c0_16, %c0_17] : memref<1x8x1xf32, #tpu.memory_space<vmem>>, vector<1x8x1xf32>
      tpu.vector_store %arg3[%c0_15, %c0_16, %c0_17], %17 {strides = array<i32>} : memref<1x8x1xf32, #tpu.memory_space<vmem>>, vector<1x8x1xf32>,
    } else {
    }
    return
  }
  func.func @transform_0(%arg0: i32, %arg1: i32) -> (i32, i32) {
    %c0_i32 = arith.constant 0 : i32
    return %arg0, %arg1 : i32, i32
  }
  func.func @transform_1(%arg0: i32, %arg1: i32) -> (i32, i32, i32) {
    %c0_i32 = arith.constant 0 : i32
    %c0_i32_0 = arith.constant 0 : i32
    %c0_i32_1 = arith.constant 0 : i32
    return %arg0, %c0_i32, %c0_i32_0 : i32, i32, i32
  }
}

</mosaic_0001>

<bundles_post_ra>
// kernel: tpu_custom_call.1
= control target key start
LH: loop header
LB: loop body
LE: loop exit
PB: predicated region body
PF: predicated region fallthrough
CT: control target
= control target key end

     0   :  { %6 = vsyncpa [#allocation4], 0  ;;  %s71_s6 = smov [#allocation3]   ;;  %s97_s0 = inlined_call_operand.hbm [shape: f32[8,256], index: 0, kind: input, shape index: {}]   ;;  %s98_s1 = inlined_call_operand.vmem [shape: f32[1,8,1], index: 1, kind: output, shape index: {}]  }
   0x1   :  { %s13_s7 = sshll.u32 %s71_s6, 4  ;;  %s47_s10 = scalar_lea.hbm %s97_s0, 256  ;;  %s14_s7 = int_to_ptr.vmem [resolvable:$true] %s13_s7 }
   0x2   :  { %p48_p0 = scmp.ne.s32.totalorder %s97_s0, %s47_s10  ;;  %p51_p1 = scmp.lt.u32.totalorder %s47_s10, %s97_s0 }
   0x4   :  { %p53_p2 = pnand %p51_p1, %p48_p0 }
   0x6   :  { %56 = shalt.err (!%p53_p2)
}
   0x7   :  { %s57_s15 = scalar_lea.vmem %s14_s7, 256  ;;  %p62_p4 = scmp.lt.s32.totalorder %s14_s7, %s14_s7 }
   0x8   :  { %p58_p3 = scmp.ne.s32.totalorder %s14_s7, %s57_s15  ;;  %p63_p5 = scmp.lt.s32.totalorder %s57_s15, %s57_s15 }
   0xa   :  { %p64_p6 = por %p63_p5, %p62_p4 }
   0xc   :  { %p65_p7 = pnand %p64_p6, %p58_p3 }
   0xe   :  { %68 = shalt.err (!%p65_p7)
}
   0xf   :  { %16 = dma.hbm_to_vmem [thread:$0]  %s97_s0, 256, %s14_s7, [#allocation4]  }
  0x10   :  { %69 = dma.done.wait [#allocation4], 256  }
  0x11   :  { %70 = vsyncadd [#allocation4], 4294967040  ;;  %v25_v0 = vld [vmem:[#allocation3] sm:$0xff]  ;;  %v29_v1 = vld [vmem:[#allocation3 + $0x8] sm:$0xff]  ;;  %vm39_vm0 = vcmask 7168  }
  0x12   :  { %v31_v2 = vmax.f32 %v25_v0, %v29_v1 }
  0x14   :  { %37 = vmax.xlane.f32.xlu0 %v31_v2 }
  0xa1   :  { %v38_v3 = vpop.xlane.xlu0 %37 }
  0xa2   :  { %40 = vst.msk [vmem:[%s98_s1] sm:$0xff] %vm39_vm0, %v38_v3 }
  0xa3   :  { %45 = vsyncpa [#allocation4], 1 }

</bundles_post_ra>
